<compile_context>
chip_gen: v7x
topology: tpu7x:2x2x1
jax: 0.10.0
libtpu: 0.0.40
codegen_flags: <defaults>
</compile_context>

<pallas_src>
import functools

import jax
import jax.numpy as jnp
from jax import lax
from jax.experimental import pallas as pl
from jax.experimental.pallas import tpu as pltpu

# ---- model hyper-params (strategy='equal') -------------------------------
D_MODEL = 32
NUM_HEADS = 4
HEAD_DIM = D_MODEL // NUM_HEADS   # 'equal' strategy -> [8, 8, 8, 8]
LN_EPS = 1e-5
NEG_INF = -1e30                   # finite "-inf" (avoids inf-inf hazards)


def mha_kernel(x_ref, wq_ref, bq_ref, wk_ref, bk_ref, wvo_ref, bvo_ref,
               sbias_ref, bo_ref, gamma_ref, beta_ref, o_ref, *, seq):
    """One grid step = one batch element.

    x_ref:   (S, D)
    wq_ref:  (H*D, Dh)   bq_ref:  (H*S, Dh)      (scale 1/sqrt(Dh) folded in)
    wk_ref:  (H*D, Dh)   bk_ref:  (H*S, Dh)
    wvo_ref: (H*D, D)    bvo_ref: (H*S, D)       (Wo + v-bias folded in)
    sbias_ref: (H*S, H*S)  additive head mask (0 on-diag blocks, -1e30 off)
    bo/gamma/beta: (1, D)   o_ref: (S, D)
    """
    H, D, S = NUM_HEADS, D_MODEL, seq

    x = x_ref[...].astype(jnp.float32)                                # [S, D]

    # Block-diagonal replicated input: row-block h carries x in lane-block h,
    # zeros elsewhere. ONE matmul against row-stacked per-head weights then
    # yields head-stacked projections directly (no per-head lane slices, no
    # transposes). Built with plain concatenates (well-supported lowering).
    zeros = jnp.zeros_like(x)
    x_bd = jnp.concatenate(
        [jnp.concatenate([x if hc == hr else zeros for hc in range(H)], axis=1)
         for hr in range(H)], axis=0)                                 # [H*S, H*D]

    # Head-stacked projections: one MXU pass each.
    q = jnp.dot(x_bd, wq_ref[...],
                preferred_element_type=jnp.float32) + bq_ref[...]    # [H*S, Dh]
    k = jnp.dot(x_bd, wk_ref[...],
                preferred_element_type=jnp.float32) + bk_ref[...]    # [H*S, Dh]
    vproj = jnp.dot(x_bd, wvo_ref[...],
                    preferred_element_type=jnp.float32) + bvo_ref[...]  # [H*S, D]

    # ONE scores matmul for all heads (contract last dims; no explicit k.T),
    # cross-head blocks masked to -inf before the softmax max/exp.
    s = lax.dot_general(q, k, (((1,), (1,)), ((), ())),
                        preferred_element_type=jnp.float32)           # [H*S, H*S]
    s = s + sbias_ref[...]

    # Numerically-stable softmax over full rows (masked lanes exp to 0).
    m = jnp.max(s, axis=-1, keepdims=True)
    e = jnp.exp(s - m)
    p = e / jnp.sum(e, axis=-1, keepdims=True)   # exact divide (review: no approx recip)

    # ONE P@V matmul; V already carries Wo, so each head lands in output
    # space and concat + linear_out collapse to a segmented head-block sum.
    out_rows = jnp.dot(p, vproj, preferred_element_type=jnp.float32)  # [H*S, D]

    out = out_rows[0:S]
    for h in range(1, H):                         # static, vreg-aligned slices
        out = out + out_rows[h * S:(h + 1) * S]                       # [S, D]

    # output bias + residual + LayerNorm over the last dim.
    out = out + bo_ref[...] + x
    mean = jnp.mean(out, axis=-1, keepdims=True)
    cen = out - mean
    var = jnp.mean(cen * cen, axis=-1, keepdims=True)
    y = cen * lax.rsqrt(var + LN_EPS) * gamma_ref[...] + beta_ref[...]

    o_ref[...] = y.astype(o_ref.dtype)


def _pack_params(p, seq):
    """Pack per-head params into the row-stacked, fused layouts.

    Returns (in kernel-argument order):
      wq_stack [H*D, Dh]  (q scale folded), bq_rows [H*S, Dh]
      wk_stack [H*D, Dh],                   bk_rows [H*S, Dh]
      wvo_stack [H*D, D]  (Wv_h @ Wo_h),    bvo_rows [H*S, D] (bv_h @ Wo_h)
      sbias [H*S, H*S]    block-diagonal additive score mask
      bo, gamma, beta     (unchanged, [1, D])
    """
    H, D, Dh = NUM_HEADS, D_MODEL, HEAD_DIM
    scale = 1.0 / (float(Dh) ** 0.5)

    wq_stack = (p["wq"] * scale).reshape(H * D, Dh)
    wk_stack = p["wk"].reshape(H * D, Dh)

    wo3 = p["wo"].reshape(H, Dh, D)            # head row-blocks of linear_out
    wvo_stack = jnp.einsum("hcd,hde->hce", p["wv"], wo3).reshape(H * D, D)

    bq_rows = jnp.repeat(p["bq"].reshape(H, Dh) * scale, seq, axis=0)
    bk_rows = jnp.repeat(p["bk"].reshape(H, Dh), seq, axis=0)
    bvo_rows = jnp.repeat(
        jnp.einsum("hd,hde->he", p["bv"].reshape(H, Dh), wo3), seq, axis=0)

    head_id = jnp.arange(H * seq) // seq
    sbias = jnp.where(head_id[:, None] == head_id[None, :],
                      0.0, NEG_INF).astype(jnp.float32)

    return (wq_stack, bq_rows, wk_stack, bk_rows, wvo_stack, bvo_rows, sbias,
            p["bo"], p["gamma"], p["beta"])


@jax.jit
def multi_head_attention(x, params):
    """x: [B, S, D_MODEL] float32. params: dict of per-head weights."""
    B, S, D = x.shape
    assert D == D_MODEL

    packed = _pack_params(params, S)
    x2d = x.reshape(B * S, D)

    def _full(shape):
        return pl.BlockSpec(tuple(shape), lambda b, _n=len(shape): (0,) * _n)

    out2d = pl.pallas_call(
        functools.partial(mha_kernel, seq=S),
        out_shape=jax.ShapeDtypeStruct((B * S, D), x.dtype),
        grid_spec=pltpu.PrefetchScalarGridSpec(
            num_scalar_prefetch=0,
            grid=(B,),                                   # batch on the grid
            in_specs=[pl.BlockSpec((S, D), lambda b: (b, 0))]   # x (per batch)
                     + [_full(w.shape) for w in packed],        # packed weights
            out_specs=pl.BlockSpec((S, D), lambda b: (b, 0)),
        ),
        compiler_params=pltpu.CompilerParams(
            dimension_semantics=("parallel",)),          # 2 TCs on v7x
    )(x2d, *packed)

    return out2d.reshape(B, S, D)


def init_params(key):
    """Deterministic synthetic parameter init (shapes match the torch module)."""
    ks = jax.random.split(key, 8)
    scale_in = 1.0 / (D_MODEL ** 0.5)
    return {
        "wq": jax.random.normal(ks[0], (NUM_HEADS, D_MODEL, HEAD_DIM), jnp.float32) * scale_in,
        "wk": jax.random.normal(ks[1], (NUM_HEADS, D_MODEL, HEAD_DIM), jnp.float32) * scale_in,
        "wv": jax.random.normal(ks[2], (NUM_HEADS, D_MODEL, HEAD_DIM), jnp.float32) * scale_in,
        "bq": jax.random.normal(ks[3], (NUM_HEADS, 1, HEAD_DIM), jnp.float32) * 0.01,
        "bk": jax.random.normal(ks[4], (NUM_HEADS, 1, HEAD_DIM), jnp.float32) * 0.01,
        "bv": jax.random.normal(ks[5], (NUM_HEADS, 1, HEAD_DIM), jnp.float32) * 0.01,
        "wo": jax.random.normal(ks[6], (D_MODEL, D_MODEL), jnp.float32) * scale_in,
        "bo": jax.random.normal(ks[7], (1, D_MODEL), jnp.float32) * 0.01,
        "gamma": jnp.ones((1, D_MODEL), jnp.float32),
        "beta": jnp.zeros((1, D_MODEL), jnp.float32),
    }


def reference_mha(x, p):
    """Pure-JAX reference of the torch forward (eval mode, mask=None)."""
    outs = []
    for h in range(NUM_HEADS):
        q = x @ p["wq"][h] + p["bq"][h]
        k = x @ p["wk"][h] + p["bk"][h]
        v = x @ p["wv"][h] + p["bv"][h]
        s = jnp.einsum("bqd,bkd->bqk", q, k) / (HEAD_DIM ** 0.5)
        a = jax.nn.softmax(s, axis=-1)
        outs.append(jnp.einsum("bqk,bkd->bqd", a, v))
    concat = jnp.concatenate(outs, axis=-1)
    out = concat @ p["wo"] + p["bo"]
    out = out + x
    mean = jnp.mean(out, axis=-1, keepdims=True)
    var = jnp.mean((out - mean) ** 2, axis=-1, keepdims=True)
    return (out - mean) * lax.rsqrt(var + LN_EPS) * p["gamma"] + p["beta"]


if __name__ == "__main__":
    key = jax.random.PRNGKey(0)
    k_x, k_p = jax.random.split(key)

    B, S = 2, 8
    x = jax.random.normal(k_x, (B, S, D_MODEL), jnp.float32)
    params = init_params(k_p)

    out = multi_head_attention(x, params)
    out = jax.block_until_ready(out)

    ref = reference_mha(x, params)
    assert out.shape == (B, S, D_MODEL)
    # Exact softmax divide now -> only fp re-association error (weight folding).
    assert jnp.allclose(out, ref, atol=1e-4, rtol=1e-4), "mismatch vs JAX reference"

    print("KERNEL_OK")
</pallas_src>

<mosaic_0001>
module attributes {stable_mosaic.version = 11 : i64} {
  func.func @mha_kernel(%arg0: i32, %arg1: memref<8x32xf32, #tpu.memory_space<vmem>>, %arg2: memref<128x8xf32, #tpu.memory_space<vmem>>, %arg3: memref<32x8xf32, #tpu.memory_space<vmem>>, %arg4: memref<128x8xf32, #tpu.memory_space<vmem>>, %arg5: memref<32x8xf32, #tpu.memory_space<vmem>>, %arg6: memref<128x32xf32, #tpu.memory_space<vmem>>, %arg7: memref<32x32xf32, #tpu.memory_space<vmem>>, %arg8: memref<32x32xf32, #tpu.memory_space<vmem>>, %arg9: memref<1x32xf32, #tpu.memory_space<vmem>>, %arg10: memref<1x32xf32, #tpu.memory_space<vmem>>, %arg11: memref<1x32xf32, #tpu.memory_space<vmem>>, %arg12: memref<8x32xf32, #tpu.memory_space<vmem>>) attributes {dimension_semantics = [#tpu.dimension_semantics<parallel>], iteration_bounds = array<i64: 2>, scalar_prefetch = 0 : i64, scratch_operands = 0 : i64, tpu.core_type = #tpu.core_type<tc>, window_params = [{transform_indices = @transform_0, window_bounds = array<i64: 8, 32>}, {pipeline_mode = #tpu.pipeline_mode<synchronous>, transform_indices = @transform_1, window_bounds = array<i64: 128, 8>}, {pipeline_mode = #tpu.pipeline_mode<synchronous>, transform_indices = @transform_2, window_bounds = array<i64: 32, 8>}, {pipeline_mode = #tpu.pipeline_mode<synchronous>, transform_indices = @transform_3, window_bounds = array<i64: 128, 8>}, {pipeline_mode = #tpu.pipeline_mode<synchronous>, transform_indices = @transform_4, window_bounds = array<i64: 32, 8>}, {pipeline_mode = #tpu.pipeline_mode<synchronous>, transform_indices = @transform_5, window_bounds = array<i64: 128, 32>}, {pipeline_mode = #tpu.pipeline_mode<synchronous>, transform_indices = @transform_6, window_bounds = array<i64: 32, 32>}, {pipeline_mode = #tpu.pipeline_mode<synchronous>, transform_indices = @transform_7, window_bounds = array<i64: 32, 32>}, {pipeline_mode = #tpu.pipeline_mode<synchronous>, transform_indices = @transform_8, window_bounds = array<i64: 1, 32>}, {pipeline_mode = #tpu.pipeline_mode<synchronous>, transform_indices = @transform_9, window_bounds = array<i64: 1, 32>}, {pipeline_mode = #tpu.pipeline_mode<synchronous>, transform_indices = @transform_10, window_bounds = array<i64: 1, 32>}, {transform_indices = @transform_11, window_bounds = array<i64: 8, 32>}]} {
    %c0 = arith.constant 0 : index
    %c0_0 = arith.constant 0 : index
    %0 = vector.load %arg1[%c0, %c0_0] : memref<8x32xf32, #tpu.memory_space<vmem>>, vector<8x32xf32>
    %cst = arith.constant 0.000000e+00 : f32
    %1 = vector.broadcast %cst : f32 to vector<8x32xf32>
    %2 = tpu.concatenate %0, %1, %1, %1 in 1 : vector<8x32xf32>, vector<8x32xf32>, vector<8x32xf32>, vector<8x32xf32> -> vector<8x128xf32>
    %3 = tpu.concatenate %1, %0, %1, %1 in 1 : vector<8x32xf32>, vector<8x32xf32>, vector<8x32xf32>, vector<8x32xf32> -> vector<8x128xf32>
    %4 = tpu.concatenate %1, %1, %0, %1 in 1 : vector<8x32xf32>, vector<8x32xf32>, vector<8x32xf32>, vector<8x32xf32> -> vector<8x128xf32>
    %5 = tpu.concatenate %1, %1, %1, %0 in 1 : vector<8x32xf32>, vector<8x32xf32>, vector<8x32xf32>, vector<8x32xf32> -> vector<8x128xf32>
    %6 = tpu.concatenate %2, %3, %4, %5 in 0 : vector<8x128xf32>, vector<8x128xf32>, vector<8x128xf32>, vector<8x128xf32> -> vector<32x128xf32>
    %c0_1 = arith.constant 0 : index
    %c0_2 = arith.constant 0 : index
    %7 = vector.load %arg2[%c0_1, %c0_2] : memref<128x8xf32, #tpu.memory_space<vmem>>, vector<128x8xf32>
    %cst_3 = arith.constant dense<0.000000e+00> : vector<32x8xf32>
    %8 = tpu.matmul %6, %7, %cst_3 {dimension_numbers = #tpu.dot_dimension_numbers<[1], [0], [0], [1], [0, 0, 1, 1], [], []>} : vector<32x128xf32>, vector<128x8xf32>, vector<32x8xf32> -> vector<32x8xf32>
    %c0_4 = arith.constant 0 : index
    %c0_5 = arith.constant 0 : index
    %9 = vector.load %arg3[%c0_4, %c0_5] : memref<32x8xf32, #tpu.memory_space<vmem>>, vector<32x8xf32>
    %10 = arith.addf %8, %9 : vector<32x8xf32>
    %c0_6 = arith.constant 0 : index
    %c0_7 = arith.constant 0 : index
    %11 = vector.load %arg4[%c0_6, %c0_7] : memref<128x8xf32, #tpu.memory_space<vmem>>, vector<128x8xf32>
    %cst_8 = arith.constant dense<0.000000e+00> : vector<32x8xf32>
    %12 = tpu.matmul %6, %11, %cst_8 {dimension_numbers = #tpu.dot_dimension_numbers<[1], [0], [0], [1], [0, 0, 1, 1], [], []>} : vector<32x128xf32>, vector<128x8xf32>, vector<32x8xf32> -> vector<32x8xf32>
    %c0_9 = arith.constant 0 : index
    %c0_10 = arith.constant 0 : index
    %13 = vector.load %arg5[%c0_9, %c0_10] : memref<32x8xf32, #tpu.memory_space<vmem>>, vector<32x8xf32>
    %14 = arith.addf %12, %13 : vector<32x8xf32>
    %c0_11 = arith.constant 0 : index
    %c0_12 = arith.constant 0 : index
    %15 = vector.load %arg6[%c0_11, %c0_12] : memref<128x32xf32, #tpu.memory_space<vmem>>, vector<128x32xf32>
    %cst_13 = arith.constant dense<0.000000e+00> : vector<32x32xf32>
    %16 = tpu.matmul %6, %15, %cst_13 {dimension_numbers = #tpu.dot_dimension_numbers<[1], [0], [0], [1], [0, 0, 1, 1], [], []>} : vector<32x128xf32>, vector<128x32xf32>, vector<32x32xf32> -> vector<32x32xf32>
    %c0_14 = arith.constant 0 : index
    %c0_15 = arith.constant 0 : index
    %17 = vector.load %arg7[%c0_14, %c0_15] : memref<32x32xf32, #tpu.memory_space<vmem>>, vector<32x32xf32>
    %18 = arith.addf %16, %17 : vector<32x32xf32>
    %cst_16 = arith.constant dense<0.000000e+00> : vector<32x32xf32>
    %19 = tpu.matmul %10, %14, %cst_16 {dimension_numbers = #tpu.dot_dimension_numbers<[1], [1], [0], [0], [0, 0, 1, 0], [], []>} : vector<32x8xf32>, vector<32x8xf32>, vector<32x32xf32> -> vector<32x32xf32>
    %c0_17 = arith.constant 0 : index
    %c0_18 = arith.constant 0 : index
    %20 = vector.load %arg8[%c0_17, %c0_18] : memref<32x32xf32, #tpu.memory_space<vmem>>, vector<32x32xf32>
    %21 = arith.addf %19, %20 : vector<32x32xf32>
    %cst_19 = arith.constant dense<0xFF800000> : vector<32xf32>
    %22 = vector.multi_reduction <maximumf>, %21, %cst_19 [1] : vector<32x32xf32> to vector<32xf32>
    %23 = vector.shape_cast %22 : vector<32xf32> to vector<32x1xf32>
    %24 = vector.broadcast %23 : vector<32x1xf32> to vector<32x32xf32>
    %25 = arith.subf %21, %24 : vector<32x32xf32>
    %26 = math.exp %25 : vector<32x32xf32>
    %cst_20 = arith.constant dense<0.000000e+00> : vector<32xf32>
    %27 = vector.multi_reduction <add>, %26, %cst_20 [1] : vector<32x32xf32> to vector<32xf32>
    %28 = vector.shape_cast %27 : vector<32xf32> to vector<32x1xf32>
    %29 = vector.broadcast %28 : vector<32x1xf32> to vector<32x32xf32>
    %30 = arith.divf %26, %29 : vector<32x32xf32>
    %cst_21 = arith.constant dense<0.000000e+00> : vector<32x32xf32>
    %31 = tpu.matmul %30, %18, %cst_21 {dimension_numbers = #tpu.dot_dimension_numbers<[1], [0], [0], [1], [0, 0, 1, 1], [], []>} : vector<32x32xf32>, vector<32x32xf32>, vector<32x32xf32> -> vector<32x32xf32>
    %32 = vector.extract_strided_slice %31 {offsets = [0, 0], sizes = [8, 32], strides = [1, 1]} : vector<32x32xf32> to vector<8x32xf32>
    %33 = vector.extract_strided_slice %31 {offsets = [8, 0], sizes = [8, 32], strides = [1, 1]} : vector<32x32xf32> to vector<8x32xf32>
    %34 = arith.addf %32, %33 : vector<8x32xf32>
    %35 = vector.extract_strided_slice %31 {offsets = [16, 0], sizes = [8, 32], strides = [1, 1]} : vector<32x32xf32> to vector<8x32xf32>
    %36 = arith.addf %34, %35 : vector<8x32xf32>
    %37 = vector.extract_strided_slice %31 {offsets = [24, 0], sizes = [8, 32], strides = [1, 1]} : vector<32x32xf32> to vector<8x32xf32>
    %38 = arith.addf %36, %37 : vector<8x32xf32>
    %c0_22 = arith.constant 0 : index
    %c0_23 = arith.constant 0 : index
    %39 = vector.load %arg9[%c0_22, %c0_23] : memref<1x32xf32, #tpu.memory_space<vmem>>, vector<1x32xf32>
    %40 = vector.broadcast %39 : vector<1x32xf32> to vector<8x32xf32>
    %41 = arith.addf %38, %40 : vector<8x32xf32>
    %42 = arith.addf %41, %0 : vector<8x32xf32>
    %cst_24 = arith.constant dense<0.000000e+00> : vector<8xf32>
    %43 = vector.multi_reduction <add>, %42, %cst_24 [1] : vector<8x32xf32> to vector<8xf32>
    %44 = vector.shape_cast %43 : vector<8xf32> to vector<8x1xf32>
    %cst_25 = arith.constant 3.200000e+01 : f32
    %45 = vector.broadcast %cst_25 : f32 to vector<8x1xf32>
    %46 = arith.divf %44, %45 : vector<8x1xf32>
    %47 = vector.broadcast %46 : vector<8x1xf32> to vector<8x32xf32>
    %48 = arith.subf %42, %47 : vector<8x32xf32>
    %49 = arith.mulf %48, %48 : vector<8x32xf32>
    %cst_26 = arith.constant dense<0.000000e+00> : vector<8xf32>
    %50 = vector.multi_reduction <add>, %49, %cst_26 [1] : vector<8x32xf32> to vector<8xf32>
    %51 = vector.shape_cast %50 : vector<8xf32> to vector<8x1xf32>
    %cst_27 = arith.constant 3.200000e+01 : f32
    %52 = vector.broadcast %cst_27 : f32 to vector<8x1xf32>
    %53 = arith.divf %51, %52 : vector<8x1xf32>
    %cst_28 = arith.constant 9.99999974E-6 : f32
    %54 = vector.broadcast %cst_28 : f32 to vector<8x1xf32>
    %55 = arith.addf %53, %54 : vector<8x1xf32>
    %56 = math.rsqrt %55 : vector<8x1xf32>
    %57 = vector.broadcast %56 : vector<8x1xf32> to vector<8x32xf32>
    %58 = arith.mulf %48, %57 : vector<8x32xf32>
    %c0_29 = arith.constant 0 : index
    %c0_30 = arith.constant 0 : index
    %59 = vector.load %arg10[%c0_29, %c0_30] : memref<1x32xf32, #tpu.memory_space<vmem>>, vector<1x32xf32>
    %60 = vector.broadcast %59 : vector<1x32xf32> to vector<8x32xf32>
    %61 = arith.mulf %58, %60 : vector<8x32xf32>
    %c0_31 = arith.constant 0 : index
    %c0_32 = arith.constant 0 : index
    %62 = vector.load %arg11[%c0_31, %c0_32] : memref<1x32xf32, #tpu.memory_space<vmem>>, vector<1x32xf32>
    %63 = vector.broadcast %62 : vector<1x32xf32> to vector<8x32xf32>
    %64 = arith.addf %61, %63 : vector<8x32xf32>
    %c0_33 = arith.constant 0 : index
    %c0_34 = arith.constant 0 : index
    %65 = vector.load %arg12[%c0_33, %c0_34] : memref<8x32xf32, #tpu.memory_space<vmem>>, vector<8x32xf32>
    tpu.vector_store %arg12[%c0_33, %c0_34], %64 {strides = array<i32>} : memref<8x32xf32, #tpu.memory_space<vmem>>, vector<8x32xf32>,
    return
  }
  func.func @transform_0(%arg0: i32) -> (i32, i32) {
    %c0_i32 = arith.constant 0 : i32
    %c0_i32_0 = arith.constant 0 : i32
    return %arg0, %c0_i32 : i32, i32
  }
  func.func @transform_1(%arg0: i32) -> (i32, i32) {
    %c0_i32 = arith.constant 0 : i32
    %c0_i32_0 = arith.constant 0 : i32
    %c0_i32_1 = arith.constant 0 : i32
    return %c0_i32, %c0_i32_0 : i32, i32
  }
  func.func @transform_2(%arg0: i32) -> (i32, i32) {
    %c0_i32 = arith.constant 0 : i32
    %c0_i32_0 = arith.constant 0 : i32
    %c0_i32_1 = arith.constant 0 : i32
    return %c0_i32, %c0_i32_0 : i32, i32
  }
  func.func @transform_3(%arg0: i32) -> (i32, i32) {
    %c0_i32 = arith.constant 0 : i32
    %c0_i32_0 = arith.constant 0 : i32
    %c0_i32_1 = arith.constant 0 : i32
    return %c0_i32, %c0_i32_0 : i32, i32
  }
  func.func @transform_4(%arg0: i32) -> (i32, i32) {
    %c0_i32 = arith.constant 0 : i32
    %c0_i32_0 = arith.constant 0 : i32
    %c0_i32_1 = arith.constant 0 : i32
    return %c0_i32, %c0_i32_0 : i32, i32
  }
  func.func @transform_5(%arg0: i32) -> (i32, i32) {
    %c0_i32 = arith.constant 0 : i32
    %c0_i32_0 = arith.constant 0 : i32
    %c0_i32_1 = arith.constant 0 : i32
    return %c0_i32, %c0_i32_0 : i32, i32
  }
  func.func @transform_6(%arg0: i32) -> (i32, i32) {
    %c0_i32 = arith.constant 0 : i32
    %c0_i32_0 = arith.constant 0 : i32
    %c0_i32_1 = arith.constant 0 : i32
    return %c0_i32, %c0_i32_0 : i32, i32
  }
  func.func @transform_7(%arg0: i32) -> (i32, i32) {
    %c0_i32 = arith.constant 0 : i32
    %c0_i32_0 = arith.constant 0 : i32
    %c0_i32_1 = arith.constant 0 : i32
    return %c0_i32, %c0_i32_0 : i32, i32
  }
  func.func @transform_8(%arg0: i32) -> (i32, i32) {
    %c0_i32 = arith.constant 0 : i32
    %c0_i32_0 = arith.constant 0 : i32
    %c0_i32_1 = arith.constant 0 : i32
    return %c0_i32, %c0_i32_0 : i32, i32
  }
  func.func @transform_9(%arg0: i32) -> (i32, i32) {
    %c0_i32 = arith.constant 0 : i32
    %c0_i32_0 = arith.constant 0 : i32
    %c0_i32_1 = arith.constant 0 : i32
    return %c0_i32, %c0_i32_0 : i32, i32
  }
  func.func @transform_10(%arg0: i32) -> (i32, i32) {
    %c0_i32 = arith.constant 0 : i32
    %c0_i32_0 = arith.constant 0 : i32
    %c0_i32_1 = arith.constant 0 : i32
    return %c0_i32, %c0_i32_0 : i32, i32
  }
  func.func @transform_11(%arg0: i32) -> (i32, i32) {
    %c0_i32 = arith.constant 0 : i32
    %c0_i32_0 = arith.constant 0 : i32
    return %arg0, %c0_i32 : i32, i32
  }
}

</mosaic_0001>

<bundles_post_ra>
// kernel: multi_head_attention.1
= control target key start
LH: loop header
LB: loop body
LE: loop exit
PB: predicated region body
PF: predicated region fallthrough
CT: control target
= control target key end

     0   :  { %s2012_s0 = inlined_call_operand.vmem [shape: f32[16,32], index: 0, kind: input, shape index: {}]   ;;  %s2013_s1 = inlined_call_operand.vmem [shape: f32[128,8], index: 1, kind: input, shape index: {}]   ;;  %s2014_s2 = inlined_call_operand.vmem [shape: f32[32,8], index: 2, kind: input, shape index: {}]   ;;  %s2015_s3 = inlined_call_operand.vmem [shape: f32[128,8], index: 3, kind: input, shape index: {}]   ;;  %s2016_s4 = inlined_call_operand.vmem [shape: f32[32,8], index: 4, kind: input, shape index: {}]   ;;  %s2017_s5 = inlined_call_operand.vmem [shape: f32[128,32], index: 5, kind: input, shape index: {}]   ;;  %s2018_s6 = inlined_call_operand.vmem [shape: f32[32,32], index: 6, kind: input, shape index: {}]   ;;  %s2019_s7 = inlined_call_operand.vmem [shape: f32[32,32], index: 7, kind: input, shape index: {}]   ;;  %s2020_s8 = inlined_call_operand.vmem [shape: f32[1,32], index: 8, kind: input, shape index: {}]   ;;  %s2021_s9 = inlined_call_operand.vmem [shape: f32[1,32], index: 9, kind: input, shape index: {}]   ;;  %s2022_s10 = inlined_call_operand.vmem [shape: f32[1,32], index: 10, kind: input, shape index: {}]   ;;  %s2023_s11 = inlined_call_operand.hbm [shape: f32[16,32], index: 11, kind: output, shape index: {}]  }
   0x1   :  { %2024 = sst [smem:[#allocation6_spill]] %s2012_s0 }
   0x2   :  { %16 = vsyncpa [#allocation3], 0 }
   0x3   :  { %18 = vsyncpa [#allocation3 + $0x1], 0  ;;  %s1653_s17 = smov 0   ;;  %s1655_s18 = smov 0  }
   0x4   :  { %s1657_s19 = smov 0   ;;  %s1659_s20 = smov 0  }
   0x5 LB: > { %s1674_s21 = sadd.s32 4294967295, %s1587_s20   ;;  %s1091_s22 = sadd.s32 4294967294, %s1587_s20   ;;  %s1587_s20 = sphi %s1659_s20, %s2035_s20   ;;  %s1583_s19 = sphi %s1657_s19, %s2034_s19   ;;  %s1579_s18 = sphi %s1655_s18, %s2033_s18   ;;  %s1575_s17 = sphi %s1653_s17, %s2032_s17  }
   0x6   : > { %s1678_s23 = sadd.s32 1, %s1587_s20   ;;  %s267_s24 = sadd.s32 1, %s1583_s19 }
   0x7   : > { %s264_s25 = ssub.s32 %s1587_s20, %s1678_s23  ;;  %p277_p0 = scmp.ne.s32.totalorder %s1583_s19, %s1579_s18 }
   0x8   : > { %p265_p1 = scmp.eq.s32.totalorder %s264_s25, 0  ;;  %p278_p2 = scmp.eq.s32.totalorder %s1674_s21, 1 }
   0x9   : > { %p283_p3 = scmp.ne.s32.totalorder %s1579_s18, %s1575_s17  ;;  %p284_p4 = scmp.eq.s32.totalorder %s1091_s22, 1 }
   0xa   : > { %s1689_s26 = scalar_select %p265_p1, %s1583_s19, %s267_s24  }
   0xb   : > { %p1691_p5 = por %p278_p2, %p277_p0  ;;  %p1695_p6 = por %p284_p4, %p283_p3 }
   0xc   : > { %2025 = sst [smem:[#allocation5_spill]] %s1689_s26  ;;  %p1094_p7 = scmp.ge.s32.totalorder %s1587_s20, 1 }
   0xd   : > { %p339_p8 = scmp.lt.s32.totalorder %s1587_s20, 3 }
   0xf   : > { %p340_p9 = pnand %p1094_p7, %p339_p8 }
  0x10   : > { %p378_p10 = scmp.lt.s32.totalorder (!%p340_p9), %s1674_s21, 1  ;;  %v405_v0 = vld [vmem:[%s2013_s1] sm:$0xff] (!%p340_p9)  ;;  %v406_v1 = vld [vmem:[%s2013_s1 + $0x8] sm:$0xff] (!%p340_p9)  ;;  %v407_v5 = vld [vmem:[%s2013_s1 + $0x10] sm:$0xff] (!%p340_p9)  ;;  %vm383_vm0 = vcmask (!%p340_p9), 261120   ;;  %s2028_s0 = sld [smem:[#allocation6_spill]] (!%p340_p9) }
  0x11   : > { %343 = sbr.rel (%p340_p9) target bundleno = 1461 (0x5b5), region = 64  ;;  %v510_v2 = vld [vmem:[%s2015_s3] sm:$0xff] (!%p340_p9)  ;;  %v1349_v3 = vpack.c.bf16 (!%p340_p9), %v406_v1, %v405_v0  ;;  %v511_v4 = vld [vmem:[%s2015_s3 + $0x8] sm:$0xff] (!%p340_p9)  ;;  %v408_v6 = vld [vmem:[%s2013_s1 + $0x18] sm:$0xff] (!%p340_p9)  ;;  %vm385_vm1 = vcmask (!%p340_p9), 523264   ;;  %s1589_s29 = smov (!%p340_p9), 32  }
  0x12   : > { %v1381_v7 = vpack.c.bf16 (!%p340_p9), %v511_v4, %v510_v2  ;;  %v1353_v8 = vpack.c.bf16 (!%p340_p9), %v408_v6, %v407_v5  ;;  %v512_v9 = vld [vmem:[%s2015_s3 + $0x10] sm:$0xff] (!%p340_p9)  ;;  %v513_v10 = vld [vmem:[%s2015_s3 + $0x18] sm:$0xff] (!%p340_p9)  ;;  %v409_v11 = vld [vmem:[%s2013_s1 + $0x20] sm:$0xff] (!%p340_p9)  ;;  %s1590_s12 = smov (!%p340_p9), 96   ;;  %vm387_vm2 = vcmask (!%p340_p9), 785408   ;;  %s1591_s25 = smov (!%p340_p9), 64  }
  0x13   : > { %1350 = vmatprep.subr.bf16.mxu0 (!%p340_p9), %v1349_v3  ;;  %v1385_v12 = vpack.c.bf16 (!%p340_p9), %v513_v10, %v512_v9  ;;  %v410_v13 = vld [vmem:[%s2013_s1 + $0x28] sm:$0xff] (!%p340_p9)  ;;  %v514_v14 = vld [vmem:[%s2015_s3 + $0x20] sm:$0xff] (!%p340_p9)  ;;  %v411_v19 = vld [vmem:[%s2013_s1 + $0x30] sm:$0xff] (!%p340_p9)  ;;  %vm724_vm4 = vcmask (!%p340_p9), 64512  }
  0x14   : > { %v515_v15 = vld [vmem:[%s2015_s3 + $0x28] sm:$0xff] (!%p340_p9)  ;;  %1352 = vmatpush3.bf16.msra.mxu0 (!%p340_p9), %v1349_v3  ;;  %1382 = vmatprep.subr.bf16.mxu1 (!%p340_p9), %v1381_v7  ;;  %v1357_v16 = vpack.c.bf16 (!%p340_p9), %v410_v13, %v409_v11  ;;  %v412_v20 = vld [vmem:[%s2013_s1 + $0x38] sm:$0xff] (!%p340_p9)  ;;  %v516_v21 = vld [vmem:[%s2015_s3 + $0x30] sm:$0xff] (!%p340_p9) }
  0x15   : > { %1384 = vmatpush3.bf16.msra.mxu1 (!%p340_p9), %v1381_v7  ;;  %1354 = vmatprep.subr.bf16.mxu0 (!%p340_p9), %v1353_v8  ;;  %v1389_v18 = vpack.c.bf16 (!%p340_p9), %v515_v15, %v514_v14  ;;  %v517_v22 = vld [vmem:[%s2015_s3 + $0x38] sm:$0xff] (!%p340_p9)  ;;  %v1361_v25 = vpack.c.bf16 (!%p340_p9), %v412_v20, %v411_v19  ;;  %v413_v27 = vld [vmem:[%s2013_s1 + $0x40] sm:$0xff] (!%p340_p9)  ;;  %v414_v28 = vld [vmem:[%s2013_s1 + $0x48] sm:$0xff] (!%p340_p9) }
  0x16   : > { %1386 = vmatprep.subr.bf16.mxu1 (!%p340_p9), %v1385_v12  ;;  %v1393_v26 = vpack.c.bf16 (!%p340_p9), %v517_v22, %v516_v21  ;;  %v518_v29 = vld [vmem:[%s2015_s3 + $0x40] sm:$0xff] (!%p340_p9)  ;;  %v519_v30 = vld [vmem:[%s2015_s3 + $0x48] sm:$0xff] (!%p340_p9)  ;;  %v1365_v31 = vpack.c.bf16 (!%p340_p9), %v414_v28, %v413_v27  ;;  %v415_v33 = vld [vmem:[%s2013_s1 + $0x50] sm:$0xff] (!%p340_p9) }
  0x17   : > { %v1397_v32 = vpack.c.bf16 (!%p340_p9), %v519_v30, %v518_v29  ;;  %v416_v34 = vld [vmem:[%s2013_s1 + $0x58] sm:$0xff] (!%p340_p9)  ;;  %v520_v35 = vld [vmem:[%s2015_s3 + $0x50] sm:$0xff] (!%p340_p9)  ;;  %v417_v39 = vld [vmem:[%s2013_s1 + $0x60] sm:$0xff] (!%p340_p9) }
  0x18   : > { %s379_s30 = scalar_select %p378_p10, %s1674_s21, 1  ;;  %1356 = vmatpush3.bf16.msra.mxu0 %v1353_v8  ;;  %v521_v36 = vld [vmem:[%s2015_s3 + $0x58] sm:$0xff]  ;;  %v1369_v37 = vpack.c.bf16 %v416_v34, %v415_v33  ;;  %v418_v40 = vld [vmem:[%s2013_s1 + $0x68] sm:$0xff]  ;;  %v522_v41 = vld [vmem:[%s2015_s3 + $0x60] sm:$0xff] }
  0x19   : > { %1388 = vmatpush3.bf16.msra.mxu1 %v1385_v12  ;;  %1358 = vmatprep.subr.bf16.mxu0 %v1357_v16  ;;  %v1401_v38 = vpack.c.bf16 %v521_v36, %v520_v35  ;;  %v523_v42 = vld [vmem:[%s2015_s3 + $0x68] sm:$0xff]  ;;  %v1373_v43 = vpack.c.bf16 %v418_v40, %v417_v39  ;;  %v419_v45 = vld [vmem:[%s2013_s1 + $0x70] sm:$0xff]  ;;  %v420_v46 = vld [vmem:[%s2013_s1 + $0x78] sm:$0xff] }
  0x1a   : > { %s1096_s14 = sshll.u32 %s379_s30, 3  ;;  %1390 = vmatprep.subr.bf16.mxu1 %v1389_v18  ;;  %v1405_v44 = vpack.c.bf16 %v523_v42, %v522_v41  ;;  %v524_v47 = vld [vmem:[%s2015_s3 + $0x70] sm:$0xff]  ;;  %v525_v48 = vld [vmem:[%s2015_s3 + $0x78] sm:$0xff]  ;;  %v1377_v49 = vpack.c.bf16 %v420_v46, %v419_v45  ;;  %v615_v51 = vld [vmem:[%s2017_s5] sm:$0xff] }
  0x1b   : > { %s381_s22 = scalar_lea.vmem %s2028_s0, %s1096_s14  ;;  %v1409_v50 = vpack.c.bf16 %v525_v48, %v524_v47  ;;  %v616_v52 = vld [vmem:[%s2017_s5 + $0x8] sm:$0xff]  ;;  %v617_v54 = vld [vmem:[%s2017_s5 + $0x10] sm:$0xff]  ;;  %v618_v55 = vld [vmem:[%s2017_s5 + $0x18] sm:$0xff] }
  0x1c   : > { %v1742_v17 = vld [vmem:[%s381_s22] sm:$0xff]  ;;  %1360 = vmatpush3.bf16.msra.mxu0 %v1357_v16  ;;  %v1413_v53 = vpack.c.bf16 %v616_v52, %v615_v51  ;;  %v1417_v58 = vpack.c.bf16 %v618_v55, %v617_v54  ;;  %v620_v61 = vld [vmem:[%s2017_s5 + $0x28] sm:$0xff]  ;;  %vm1839_vm3 = vmneg %vm387_vm2  ;;  %s375_s22 = sand.u32 1, %s1579_s18  }
  0x1d   : > { %390 = vrot.lane.b32.xlu0 %v1742_v17, %s1589_s29  ;;  %401 = vrot.lane.b32.xlu1 %v1742_v17, %s1590_s12  ;;  %v384_v23 = vsel %vm383_vm0, %v1742_v17, 0.0  ;;  %v619_v60 = vld [vmem:[%s2017_s5 + $0x20] sm:$0xff]  ;;  %v621_v3 = vld [vmem:[%s2017_s5 + $0x30] sm:$0xff]  ;;  %vm1446_vm5 = vmpackc.low %vm724_vm4, %vm724_vm4  ;;  %s1095_s24 = sshll.u32 %s375_s22, 3  ;;  %s1128_s12 = sshll.u32 %s1674_s21, 7 }
  0x1e   : > { %v1761_v24 = vsel %vm385_vm1, %v384_v23, 0.0  ;;  %1392 = vmatpush3.bf16.msra.mxu1 %v1389_v18  ;;  %1362 = vmatprep.subr.bf16.mxu0 %v1361_v25  ;;  %v1421_v2 = vpack.c.bf16 %v620_v61, %v619_v60  ;;  %v622_v4 = vld [vmem:[%s2017_s5 + $0x38] sm:$0xff]  ;;  %v623_v6 = vld [vmem:[%s2017_s5 + $0x40] sm:$0xff]  ;;  %v624_v7 = vld [vmem:[%s2017_s5 + $0x48] sm:$0xff]  ;;  %s377_s13 = scalar_lea.vmem [#allocation2], %s1095_s24  ;;  %s1969_s0 = scalar_lea.hbm %s2023_s11, %s1128_s12 }
  0x1f   : > { %1239 = vmatprep.mubr.msk.f32.mxu0 %vm387_vm2, %v1761_v24  ;;  %1277 = vmatprep.mubr.msk.f32.mxu1 %vm387_vm2, %v1761_v24  ;;  %v1425_v5 = vpack.c.bf16 %v622_v4, %v621_v3  ;;  %v1429_v8 = vpack.c.bf16 %v624_v7, %v623_v6  ;;  %v625_v9 = vld [vmem:[%s2017_s5 + $0x50] sm:$0xff]  ;;  %v626_v10 = vld [vmem:[%s2017_s5 + $0x58] sm:$0xff]  ;;  %v627_v12 = vld [vmem:[%s2017_s5 + $0x60] sm:$0xff]  ;;  %s1032_s14 = sshll.u32 %s377_s13, 4  ;;  %s1019_s26 = scalar_lea.sflag [#allocation3], %s375_s22  ;;  %s1971_s14 = int_to_ptr.vmem [resolvable:$true] %s1032_s14 }
  0x20   : > { %1394 = vmatprep.subr.bf16.mxu1 %v1393_v26  ;;  %1364 = vmatpush3.bf16.msra.mxu0 %v1361_v25  ;;  %v1433_v11 = vpack.c.bf16 %v626_v10, %v625_v9  ;;  %v628_v13 = vld [vmem:[%s2017_s5 + $0x68] sm:$0xff]  ;;  %v629_v15 = vld [vmem:[%s2017_s5 + $0x70] sm:$0xff]  ;;  %v630_v16 = vld [vmem:[%s2017_s5 + $0x78] sm:$0xff]  ;;  %s1525_s30 = scalar_lea.vmem %s1971_s14, 128  ;;  %s1592_s21 = smov [#allocation2]  }
  0x21   : > { %396 = vrot.lane.b32.xlu0 %v1742_v17, %s1591_s25  ;;  %1366 = vmatprep.subr.bf16.mxu0 %v1365_v31  ;;  %v1437_v14 = vpack.c.bf16 %v628_v13, %v627_v12  ;;  %v1441_v18 = vpack.c.bf16 %v630_v16, %v629_v15  ;;  %v527_v19 = vld [vmem:[%s2016_s4 + $0x8] sm:$0xff]  ;;  %v421_v20 = vld [vmem:[%s2014_s2] sm:$0xff]  ;;  %v529_v29 = vld [vmem:[%s2016_s4 + $0x18] sm:$0xff]  ;;  %p1526_p11 = scmp.ne.s32.totalorder %s1971_s14, %s1525_s30  ;;  %s1529_s24 = sshll.u32 %s1592_s21, 4  ;;  %s1530_s24 = int_to_ptr.vmem [resolvable:$false] %s1529_s24 }
  0x22   : > { %1396 = vmatpush3.bf16.msra.mxu1 %v1393_v26  ;;  %v526_v21 = vld [vmem:[%s2016_s4] sm:$0xff]  ;;  %v528_v30 = vld [vmem:[%s2016_s4 + $0x10] sm:$0xff]  ;;  %v422_v39 = vld [vmem:[%s2014_s2 + $0x8] sm:$0xff]  ;;  %s1531_s25 = scalar_lea.vmem %s1530_s24, 256  ;;  %p1532_p0 = scmp.lt.s32.totalorder %s1971_s14, %s1530_s24 }
  0x23   : > { %1398 = vmatprep.subr.bf16.mxu1 %v1397_v32  ;;  %v423_v40 = vld [vmem:[%s2014_s2 + $0x10] sm:$0xff]  ;;  %v424_v42 = vld [vmem:[%s2014_s2 + $0x18] sm:$0xff]  ;;  %v632_v45 = vld [vmem:[%s2018_s6 + $0x8] sm:$0xff]  ;;  %p1527_p12 = pnand %p1526_p11, %p1691_p5  ;;  %p1533_p1 = scmp.lt.s32.totalorder %s1531_s25, %s1525_s30 }
  0x24   : > { %1368 = vmatpush3.bf16.msra.mxu0 %v1365_v31  ;;  %v631_v46 = vld [vmem:[%s2018_s6] sm:$0xff]  ;;  %v634_v51 = vld [vmem:[%s2018_s6 + $0x18] sm:$0xff]  ;;  %v633_v52 = vld [vmem:[%s2018_s6 + $0x10] sm:$0xff] }
  0x25   : > { %1370 = vmatprep.subr.bf16.mxu0 %v1369_v37  ;;  %v720_v60 = vld [vmem:[%s2019_s7] sm:$0xff]  ;;  %v722_v3 = vld [vmem:[%s2019_s7 + $0x10] sm:$0xff]  ;;  %p1528_p13 = pneg %p1527_p12  ;;  %p1534_p2 = por %p1533_p1, %p1532_p0 }
  0x26   : > { %1400 = vmatpush3.bf16.msra.mxu1 %v1397_v32 }
  0x27   : > { %1402 = vmatprep.subr.bf16.mxu1 %v1401_v38  ;;  %p1535_p3 = pnand %p1534_p2, %p1528_p13 }
  0x28   : > { %1372 = vmatpush3.bf16.msra.mxu0 %v1369_v37 }
  0x29   : > { %1374 = vmatprep.subr.bf16.mxu0 %v1373_v43 }
  0x2a   : > { %1404 = vmatpush3.bf16.msra.mxu1 %v1401_v38 }
  0x2b   : > { %1406 = vmatprep.subr.bf16.mxu1 %v1405_v44 }
  0x2c   : > { %1376 = vmatpush3.bf16.msra.mxu0 %v1373_v43 }
  0x2d   : > { %1378 = vmatprep.subr.bf16.mxu0 %v1377_v49 }
  0x2e   : > { %1408 = vmatpush3.bf16.msra.mxu1 %v1405_v44 }
  0x2f   : > { %1410 = vmatprep.subr.bf16.mxu1 %v1409_v50 }
  0x30   : > { %1380 = vmatpush3.bf16.msra.mxu0 %v1377_v49 }
  0x31   : > { %1414 = vmatprep.subr.bf16.mxu0 %v1413_v53 }
  0x32   : > { %1412 = vmatpush3.bf16.msra.mxu1 %v1409_v50 }
  0x8f   : > { %v391_v56 = vpop.permute.xlu0 %390  ;;  %v402_v63 = vpop.permute.xlu1 %401 }
  0x90   : > { %v393_v57 = vsel %vm383_vm0, 0.0, %v391_v56 }
  0x91   : > { %v394_v59 = vsel %vm385_vm1, %v393_v57, 0.0 }
  0x92   : > { %1240 = vmatmul.mubr.msk.f32.vlgmr.msra.gmra.mrb[0].mxu0 %vm387_vm2, %v394_v59  ;;  %1278 = vmatmul.mubr.msk.f32.vlgmr.msra.gmra.mrb[0].mxu1 %vm387_vm2, %v394_v59 }
  0x93   : > { %1416 = vmatpush3.bf16.msra.mxu0 %v1413_v53  ;;  %v397_v62 = vpop.permute.xlu0 %396 }
  0x94   : > { %1418 = vmatprep.subr.bf16.mxu0 %v1417_v58  ;;  %v399_v1 = vsel %vm385_vm1, 0.0, %v397_v62 }
  0x95   : > { %1242 = vmatprep.mubr.msk.f32.mxu0 %vm387_vm2, %v399_v1  ;;  %1280 = vmatprep.mubr.msk.f32.mxu1 %vm387_vm2, %v399_v1 }
  0x96   : > { %1243 = vmatmul.mubr.msk.f32.gmra.mrb[2].mxu0 %vm1839_vm3, %v402_v63  ;;  %1281 = vmatmul.mubr.msk.f32.gmra.mrb[2].mxu1 %vm1839_vm3, %v402_v63 }
  0x97   : > { %1420 = vmatpush3.bf16.msra.mxu0 %v1417_v58  ;;  %1315 = vmatprep.mubr.msk.f32.mxu0 %vm387_vm2, %v1761_v24 }
  0x98   : > { %1422 = vmatprep.subr.bf16.mxu0 %v1421_v2 }
  0x9b   : > { %1424 = vmatpush3.bf16.msra.mxu0 %v1421_v2 }
  0x9c   : > { %1426 = vmatprep.subr.bf16.mxu0 %v1425_v5 }
  0x9f   : > { %1428 = vmatpush3.bf16.msra.mxu0 %v1425_v5 }
  0xa0   : > { %1430 = vmatprep.subr.bf16.mxu0 %v1429_v8 }
  0xa3   : > { %1432 = vmatpush3.bf16.msra.mxu0 %v1429_v8 }
  0xa4   : > { %1434 = vmatprep.subr.bf16.mxu0 %v1433_v11 }
  0xa7   : > { %1436 = vmatpush3.bf16.msra.mxu0 %v1433_v11 }
  0xa8   : > { %1438 = vmatprep.subr.bf16.mxu0 %v1437_v14 }
  0xab   : > { %1440 = vmatpush3.bf16.msra.mxu0 %v1437_v14 }
  0xac   : > { %1442 = vmatprep.subr.bf16.mxu0 %v1441_v18 }
  0xaf   : > { %1444 = vmatpush3.bf16.msra.mxu0 %v1441_v18 }
  0xb2   : > { %1316 = vmatmul.mubr.msk.f32.vlgmr.msra.gmra.mrb[4].mxu0 %vm387_vm2, %v394_v59  ;;  %v721_v59 = vld [vmem:[%s2019_s7 + $0x8] sm:$0xff] }
  0xb3   : > { %1318 = vmatprep.mubr.msk.f32.mxu0 %vm387_vm2, %v399_v1  ;;  %v723_v1 = vld [vmem:[%s2019_s7 + $0x18] sm:$0xff] }
  0xb6   : > { %1319 = vmatmul.mubr.msk.f32.gmra.mrb[6].mxu0 %vm1839_vm3, %v402_v63 }
 0x165   : > { %v1241_v22 = vpop.f32.mrb[0].mxu0  ;;  %v1279_v23 = vpop.f32.mrb[0].mxu1 }
 0x166   : > { %v602_v24 = vadd.f32 %v1279_v23, %v527_v19  ;;  %v491_v25 = vpop.f32.mrb[1].mxu0  ;;  %v596_v26 = vpop.f32.mrb[1].mxu1  ;;  %v497_v41 = vadd.f32 %v1241_v22, %v422_v39 }
 0x167   : > { %v492_v27 = vadd.f32 %v491_v25, %v421_v20  ;;  %v597_v28 = vadd.f32 %v596_v26, %v526_v21 }
 0x169   : > { %v1445_v31 = vpack.c.bf16 %v602_v24, %v597_v28  ;;  %1329 = vmatprep.mubr.msk.f32.mxu1 %vm724_vm4, %v492_v27  ;;  %v1244_v32 = vpop.f32.mrb[2].mxu0  ;;  %v1282_v33 = vpop.f32.mrb[2].mxu1 }
 0x16a   : > { %v612_v34 = vadd.f32 %v1282_v33, %v529_v29  ;;  %v501_v35 = vpop.f32.mrb[3].mxu0  ;;  %v606_v36 = vpop.f32.mrb[3].mxu1  ;;  %v507_v44 = vadd.f32 %v1244_v32, %v424_v42 }
 0x16b   : > { %1447 = vmatprep.subr.msk.bf16.mxu1 %vm1446_vm5, %v1445_v31  ;;  %v607_v37 = vadd.f32 %v606_v36, %v528_v30  ;;  %v502_v43 = vadd.f32 %v501_v35, %v423_v40 }
 0x16c   : > { %1450 = vmatpush3.bf16.xpose.msk.msra.mxu1 %vm1446_vm5, %v1445_v31 }
 0x16d   : > { %v1451_v38 = vpack.c.bf16 %v612_v34, %v607_v37 }
 0x16f   : > { %1453 = vmatprep.subr.msk.bf16.mxu1 %vm1446_vm5, %v1451_v38 }
 0x174   : > { %1456 = vmatpush3.bf16.xpose.msk.msra.mxu1 %vm1446_vm5, %v1451_v38 }
 0x17b   : > { %1330 = vmatmul.mubr.msk.f32.vlgmr.msra.gmra.mrb[4].mxu1 %vm724_vm4, %v497_v41 }
 0x17c   : > { %1332 = vmatprep.mubr.msk.f32.mxu1 %vm724_vm4, %v502_v43 }
 0x17f   : > { %1333 = vmatmul.mubr.msk.f32.gmra.mrb[6].mxu1 %vm724_vm4, %v507_v44 }
 0x185   : > { %v1317_v47 = vpop.f32.mrb[4].mxu0 }
 0x186   : > { %v707_v48 = vadd.f32 %v1317_v47, %v632_v45  ;;  %v701_v49 = vpop.f32.mrb[5].mxu0 }
 0x187   : > { %v702_v50 = vadd.f32 %v701_v49, %v631_v46 }
 0x189   : > { %v1457_v53 = vpack.c.bf16 %v707_v48, %v702_v50  ;;  %v1320_v54 = vpop.f32.mrb[6].mxu0  ;;  %v1124_v50 = vld [vmem:[%s2020_s8] ss:$0 sm:$0xff] }
 0x18a   : > { %v717_v55 = vadd.f32 %v1320_v54, %v634_v51  ;;  %v711_v56 = vpop.f32.mrb[7].mxu0 }
 0x18b   : > { %v712_v57 = vadd.f32 %v711_v56, %v633_v52  ;;  %1458 = vmatprep.subr.bf16.mxu1 %v1457_v53 }
 0x18c   : > { %1460 = vmatpush3.bf16.msra.mxu1 %v1457_v53 }
 0x18d   : > { %v1461_v58 = vpack.c.bf16 %v717_v55, %v712_v57 }
 0x18f   : > { %1462 = vmatprep.subr.bf16.mxu1 %v1461_v58 }
 0x190   : > { %1464 = vmatpush3.bf16.msra.mxu1 %v1461_v58 }
 0x24e   : > { %v1331_v61 = vpop.f32.mrb[4].mxu1 }
 0x24f   : > { %v821_v62 = vadd.f32 %v1331_v61, %v721_v59  ;;  %v815_v63 = vpop.f32.mrb[5].mxu1 }
 0x250   : > { %v816_v0 = vadd.f32 %v815_v63, %v720_v60 }
 0x251   : > { %v837_v2 = vsel %vm383_vm0, %v821_v62, -inf }
 0x252   : > { %838 = vmax.xlane.f32.xlu0 %v837_v2  ;;  %v1334_v4 = vpop.f32.mrb[6].mxu1  ;;  %v834_v5 = vsel %vm383_vm0, %v816_v0, -inf }
 0x253   : > { %v831_v6 = vadd.f32 %v1334_v4, %v723_v1  ;;  %v825_v7 = vpop.f32.mrb[7].mxu1  ;;  %835 = vmax.xlane.f32.xlu1 %v834_v5  ;;  %v1126_v1 = vld [vmem:[%s2022_s10] ss:$0 sm:$0xff] }
 0x254   : > { %v826_v8 = vadd.f32 %v825_v7, %v722_v3 }
 0x255   : > { %v843_v9 = vsel %vm383_vm0, %v831_v6, -inf }
 0x256   : > { %v840_v10 = vsel %vm383_vm0, %v826_v8, -inf }
 0x257   : > { %841 = vmax.xlane.f32.xlu0 %v840_v10  ;;  %844 = vmax.xlane.f32.xlu1 %v843_v9 }
 0x2df   : > { %v839_v11 = vpop.xlane.xlu0 %838 }
 0x2e0   : > { %v847_v12 = vsub.f32 %v821_v62, %v839_v11  ;;  %v836_v13 = vpop.xlane.xlu1 %835 }
 0x2e1   : > { %v846_v14 = vsub.f32 %v816_v0, %v836_v13 }
 0x2e2   : > { %v852_v15 = vmul.f32 1.442695, %v847_v12 }
 0x2e3   : > { %v850_v16 = vmul.f32 1.442695, %v846_v14 }
 0x2e4   : > { %1507 = vpow2.f32 %v852_v15  ;;  %v842_v18 = vpop.xlane.xlu0 %841  ;;  %v845_v19 = vpop.xlane.xlu1 %844 }
 0x2e5   : > { %1509 = vpow2.f32 %v850_v16  ;;  %v848_v20 = vsub.f32 %v826_v8, %v842_v18  ;;  %v849_v21 = vsub.f32 %v831_v6, %v845_v19 }
 0x2e7   : > { %v854_v22 = vmul.f32 1.442695, %v848_v20  ;;  %v856_v23 = vmul.f32 1.442695, %v849_v21 }
 0x2e9   : > { %1511 = vpow2.f32 %v854_v22 }
 0x2ea   : > { %1513 = vpow2.f32 %v856_v23 }
 0x2ee   : > { %v1508_v24 = vpop.eup %1507 }
 0x2ef   : > { %v1510_v25 = vpop.eup %1509  ;;  %v861_v26 = vsel %vm383_vm0, %v1508_v24, 0.0 }
 0x2f0   : > { %862 = vadd.xlane.f32.xlu1 %v861_v26  ;;  %v858_v27 = vsel %vm383_vm0, %v1510_v25, 0.0 }
 0x2f1   : > { %859 = vadd.xlane.f32.xlu0 %v858_v27 }
 0x2f3   : > { %v1512_v28 = vpop.eup %1511 }
 0x2f4   : > { %v1514_v29 = vpop.eup %1513  ;;  %v864_v30 = vsel %vm383_vm0, %v1512_v28, 0.0 }
 0x2f5   : > { %865 = vadd.xlane.f32.xlu0 %v864_v30  ;;  %v867_v31 = vsel %vm383_vm0, %v1514_v29, 0.0 }
 0x2f6   : > { %868 = vadd.xlane.f32.xlu1 %v867_v31 }
 0x37d   : > { %v863_v32 = vpop.xlane.xlu1 %862 }
 0x37e   : > { %1515 = vrcp.f32 %v863_v32  ;;  %v860_v33 = vpop.xlane.xlu0 %859 }
 0x37f   : > { %1517 = vrcp.f32 %v860_v33 }
 0x382   : > { %v866_v34 = vpop.xlane.xlu0 %865 }
 0x383   : > { %1519 = vrcp.f32 %v866_v34  ;;  %v869_v35 = vpop.xlane.xlu1 %868 }
 0x384   : > { %1521 = vrcp.f32 %v869_v35 }
 0x388   : > { %v1516_v36 = vpop.eup %1515 }
 0x389   : > { %v1518_v37 = vpop.eup %1517  ;;  %v873_v39 = vmul.f32 %v1516_v36, %v1508_v24 }
 0x38a   : > { %v871_v38 = vmul.f32 %v1518_v37, %v1510_v25 }
 0x38c   : > { %1343 = vmatprep.mubr.msk.f32.mxu1 %vm383_vm0, %v871_v38 }
 0x38d   : > { %v1520_v40 = vpop.eup %1519  ;;  %1344 = vmatmul.mubr.msk.f32.vlgmr.msra.gmra.mrb[8].mxu1 %vm383_vm0, %v873_v39 }
 0x38e   : > { %v1522_v41 = vpop.eup %1521  ;;  %v875_v42 = vmul.f32 %v1520_v40, %v1512_v28 }
 0x38f   : > { %v877_v43 = vmul.f32 %v1522_v41, %v1514_v29 }
 0x390   : > { %1346 = vmatprep.mubr.msk.f32.mxu1 %vm383_vm0, %v875_v42 }
 0x391   : > { %1347 = vmatmul.mubr.msk.f32.gmra.mrb[10].mxu1 %vm383_vm0, %v877_v43 }
 0x460   : > { %v1345_v44 = vpop.f32.mrb[8].mxu1 }
 0x461   : > { %v956_v45 = vpop.f32.mrb[9].mxu1 }
 0x462   : > { %v975_v46 = vadd.f32 %v1345_v44, %v956_v45 }
 0x464   : > { %v1348_v47 = vpop.f32.mrb[10].mxu1 }
 0x465   : > { %v966_v48 = vpop.f32.mrb[11].mxu1 }
 0x466   : > { %v976_v49 = vadd.f32 %v975_v46, %v966_v48 }
 0x468   : > { %v977_v51 = vadd.f32 %v1348_v47, %v976_v49 }
 0x46a   : > { %v985_v52 = vadd.f32 %v1124_v50, %v977_v51 }
 0x46c   : > { %v986_v53 = vadd.f32 %v985_v52, %v1742_v17  ;;  %v1125_v17 = vld [vmem:[%s2021_s9] ss:$0 sm:$0xff] }
 0x46e   : > { %v987_v54 = vsel %vm383_vm0, %v986_v53, 0.0 }
 0x46f   : > { %988 = vadd.xlane.f32.xlu0 %v987_v54 }
 0x4fc   : > { %v989_v55 = vpop.xlane.xlu0 %988 }
 0x4fd   : > { %v991_v56 = vmul.f32 0.03125, %v989_v55 }
 0x4ff   : > { %v992_v57 = vsub.f32 %v986_v53, %v991_v56 }
 0x501   : > { %v993_v58 = vmul.f32 %v992_v57, %v992_v57 }
 0x503   : > { %v994_v59 = vsel %vm383_vm0, %v993_v58, 0.0 }
 0x504   : > { %995 = vadd.xlane.f32.xlu1 %v994_v59 }
 0x591   : > { %v996_v60 = vpop.xlane.xlu1 %995 }
 0x592   : > { %v997_v61 = vmul.f32 0.03125, %v996_v60 }
 0x594   : > { %v998_v62 = vadd.f32 1e-05, %v997_v61 }
 0x596   : > { %1523 = vrsqrt.f32 %v998_v62 }
 0x5a0   : > { %v1524_v63 = vpop.eup %1523 }
 0x5a1   : > { %v1000_v0 = vmul.f32 %v1524_v63, %v992_v57 }
 0x5a3   : > { %v1008_v2 = vmul.f32 %v1125_v17, %v1000_v0 }
 0x5a5   : > { %v1016_v3 = vadd.f32 %v1126_v1, %v1008_v2 }
 0x5a7   : > { %1017 = vst.msk [vmem:[%s377_s13] sm:$0xff] %vm383_vm0, %v1016_v3 }
 0x5a8   : > { %1538 = shalt.err (!%p1535_p3)
}
 0x5a9   : > { %s1539_s22 = scalar_lea.hbm %s1969_s0, 128  ;;  %s1543_s13 = scalar_lea.hbm %s2023_s11, 256 }
 0x5aa   : > { %p1540_p4 = scmp.ne.s32.totalorder %s1969_s0, %s1539_s22  ;;  %p1544_p9 = scmp.lt.u32.totalorder %s1969_s0, %s2023_s11 }
 0x5ab   : > { %p1545_p10 = scmp.lt.u32.totalorder %s1543_s13, %s1539_s22  ;;  %p1547_p12 = scmp.lt.u32.totalorder %s1539_s22, %s1969_s0 }
 0x5ac   : > { %p1541_p7 = pnand %p1540_p4, %p1691_p5 }
 0x5ad   : > { %p1546_p11 = por %p1545_p10, %p1544_p9 }
 0x5ae   : > { %p1542_p8 = pneg %p1541_p7 }
 0x5af   : > { %p1548_p13 = por %p1547_p12, %p1546_p11 }
 0x5b1   : > { %p1549_p0 = pnand %p1548_p13, %p1542_p8 }
 0x5b3   : > { %1552 = shalt.err (!%p1549_p0)
}
 0x5b4   : > { %1465 = dma.vmem_to_hbm [thread:$0]  (%p1691_p5), %s1971_s14, 128, %s1969_s0, %s1019_s26  }
 0x5b5 PF: > { %p1471_p1 = scmp.ge.s32.totalorder %s1587_s20, 2  ;;  %s1044_s30 = sand.u32 1, %s1575_s17  }
 0x5b6   : > { %s1045_s21 = scalar_lea.sflag [#allocation3], %s1044_s30 }
 0x5b7   : > { %p1468_p2 = pnand %p1471_p1, %p1695_p6 }
 0x5b9   : > { %1570 = dma.done.wait (!%p1468_p2), %s1045_s21, 128  }
 0x5ba   : > { %1572 = vsyncadd (!%p1468_p2), %s1045_s21, 4294967168  ;;  %s2031_s24 = sld [smem:[#allocation5_spill]]  ;;  %p21_p3 = scmp.ge.s32.totalorder %s1678_s23, 4  }
 0x5bb   : > { %s2032_s17 = smov %s1579_s18  ;;  %s2033_s18 = smov %s1583_s19 }
 0x5bc   : > { %s2035_s20 = smov %s1678_s23  ;;  %23 = sbr.rel (!%p21_p3) target bundleno = 5 (0x5), region = 99 }
 0x5c0   : > { %s2034_s19 = smov %s2031_s24 }
 0x5c3   :  { %1050 = vsyncpa [#allocation3], 1 }
 0x5c4   :  { %1052 = vsyncpa [#allocation3 + $0x1], 1 }

</bundles_post_ra>
